<compile_context>
chip_gen: v6e
topology: v6e:2x2x1
jax: 0.10.0
libtpu: 0.0.40
codegen_flags: <defaults>
</compile_context>

<pallas_src>
import math

import jax
import jax.numpy as jnp
from jax.experimental import pallas as pl
from jax.experimental.pallas import tpu as pltpu

KERNEL_SIZE = 8
LEFT_PAD = (KERNEL_SIZE - 1) // 2          # PyTorch 'same' with even k: left=3, right=4
BN_EPS = 1e-5


# ----------------------------------------------------------------------------------
# Generation-aware block budget / scoped-VMEM limit.
# ----------------------------------------------------------------------------------
def _budgets():
    try:
        cap = int(pltpu.get_tpu_info().vmem_capacity_bytes)
    except Exception:                       # no TPU info at trace time -> conservative
        cap = 64 * 1024 * 1024
    if cap >= 96 * 1024 * 1024:             # v5e / v6e: 128 MiB physical VMEM
        return 8 * 1024 * 1024, 64 * 1024 * 1024
    return 6 * 1024 * 1024, 44 * 1024 * 1024   # v7x: 64 MiB physical VMEM


def _divisors(n):
    return [d for d in range(1, n + 1) if n % d == 0]


def _sublane_align(itemsize):
    # Native sublane packing: f32 -> 8 rows, bf16 -> 16, int8/fp8 -> 32.
    return max(8, 32 // itemsize)


def _pick_gate_tiles(n, c, length, itemsize, budget, align):
    """(n_blk, c_blk) for the pool+conv kernel.  Prefers >=2 batch tiles so the
    'parallel' batch axis can be sharded across both TCs on v7x, and always tiles
    the batch so the fallback cannot blow past the VMEM budget."""
    n_cands = [d for d in _divisors(n) if d <= max(1, n // 2)] or [1]
    n_blk = max(n_cands)
    c_cands = [d for d in _divisors(c) if d % align == 0 or d == c]
    row = length * itemsize
    fitting = [d for d in c_cands if n_blk * d * row <= budget]
    if fitting:
        return n_blk, max(fitting)
    c_blk = min(c_cands)
    while n_blk > 1 and n_blk * c_blk * row > budget:
        n_blk = max(d for d in _divisors(n) if d < n_blk)
    return n_blk, c_blk


def _pick_apply_tiles(n, mid, lane, itemsize, budget, align):
    """(n_blk, mid_blk) for the elementwise apply kernel."""
    mid_cands = [d for d in _divisors(mid) if d % align == 0 or d == mid]
    row = lane * itemsize
    fitting = [d for d in mid_cands if d * row <= budget]
    mid_blk = max(fitting) if fitting else min(mid_cands)
    n_fit = [d for d in _divisors(n) if d * mid_blk * row <= budget]
    n_blk = max(n_fit) if n_fit else 1
    return n_blk, mid_blk


# ----------------------------------------------------------------------------------
# Kernel 1: channel pool (reduction over channel tiles) + k=8 'same' conv.
# Note: L is kept whole on the lane axis (the conv needs the full row); tiling L would
# require halo exchange and is not needed for the intended shapes.
# ----------------------------------------------------------------------------------
def _make_pool_conv_kernel(c_total, length):
    def kernel(x_ref, w_ref, conv_ref, max_acc, sum_acc):
        ci = pl.program_id(1)

        @pl.when(ci == 0)
        def _init():
            max_acc[...] = jnp.full_like(max_acc, -jnp.inf)
            sum_acc[...] = jnp.zeros_like(sum_acc)

        # Accumulate channel max / sum for this (batch tile, channel tile) in f32.
        xb = x_ref[...].astype(jnp.float32)                     # (n_blk, c_blk, L)
        max_acc[...] = jnp.maximum(max_acc[...], jnp.max(xb, axis=1, keepdims=True))
        sum_acc[...] = sum_acc[...] + jnp.sum(xb, axis=1, keepdims=True)

        @pl.when(ci == pl.num_programs(1) - 1)
        def _finalize():
            x_max = max_acc[...]                                # (n_blk, 1, L)
            x_mean = sum_acc[...] * (1.0 / c_total)

            # Conv1d(2 -> 1, k=8, padding='same') as shifted accumulates on the lane
            # axis:  conv[b, l] = sum_t w[0,t]*x_max[b, l+t-3] + w[1,t]*x_mean[b, l+t-3]
            # Fuse the two inputs per tap first, then roll ONCE per tap (halves XLU work).
            lane = jax.lax.broadcasted_iota(jnp.int32, x_max.shape, 2)
            conv = jnp.zeros(x_max.shape, jnp.float32)
            for t in range(KERNEL_SIZE):
                s = t - LEFT_PAD                                # read offset into input
                y = x_max * w_ref[0, t] + x_mean * w_ref[1, t]  # SMEM scalar weights
                if s == 0:
                    conv = conv + y
                else:
                    y = pltpu.roll(y, shift=(-s) % length, axis=2)   # y[l] <- in[l + s]
                    valid = (lane >= max(0, -s)) & (lane < length - max(0, s))
                    conv = conv + jnp.where(valid, y, 0.0)
            conv_ref[...] = conv

    return kernel


# ----------------------------------------------------------------------------------
# Kernel 2 (micro): conv bias + train-mode BatchNorm1d(1) over all N*L + ReLU + sigmoid.
# Kept separate so kernel 1's batch axis can be 'parallel' (global BN stats need all N).
# ----------------------------------------------------------------------------------
def _bn_gate_kernel(conv_ref, p_ref, gate_ref):
    conv = conv_ref[...] + p_ref[0]                             # conv bias
    mu = jnp.mean(conv)
    var = jnp.mean((conv - mu) ** 2)                            # biased batch variance
    bn = (conv - mu) * jax.lax.rsqrt(var + BN_EPS) * p_ref[1] + p_ref[2]
    g = jnp.maximum(bn, 0.0)                                    # ReLU
    gate_ref[...] = pl.reciprocal(1.0 + jnp.exp(-g), approx=False)   # sigmoid (exact)


# ----------------------------------------------------------------------------------
# Kernel 3: out = x * gate (gate broadcast over the middle axis), in the input dtype.
# ----------------------------------------------------------------------------------
def _apply_kernel(x_ref, gate_ref, o_ref):
    x = x_ref[...]
    o_ref[...] = (x * gate_ref[...].astype(x.dtype)).astype(o_ref.dtype)


def spatial_gate(x, conv_w, conv_b, bn_gamma, bn_beta):
    n, c, length = x.shape
    itemsize = jnp.dtype(x.dtype).itemsize
    align = _sublane_align(itemsize)
    budget, vmem_limit = _budgets()

    # Glue: conv weights (2, K) and [bias, gamma, beta] live in SMEM.
    w = conv_w.reshape(2, KERNEL_SIZE).astype(jnp.float32)
    params = jnp.concatenate(
        [conv_b.ravel(), bn_gamma.ravel(), bn_beta.ravel()]).astype(jnp.float32)

    # ---- Kernel 1: channel pool + conv, grid = (batch tiles [parallel], channel tiles
    #      [arbitrary, reduction last]) -> (N, 1, L) conv output in f32 ----
    n_blk, c_blk = _pick_gate_tiles(n, c, length, itemsize, budget, align)
    conv_out = pl.pallas_call(
        _make_pool_conv_kernel(c, length),
        out_shape=jax.ShapeDtypeStruct((n, 1, length), jnp.float32),
        grid=(n // n_blk, c // c_blk),
        in_specs=[
            pl.BlockSpec((n_blk, c_blk, length), lambda ni, ci: (ni, ci, 0)),
            pl.BlockSpec(memory_space=pltpu.MemorySpace.SMEM),    # conv weights (2, 8)
        ],
        out_specs=pl.BlockSpec((n_blk, 1, length), lambda ni, ci: (ni, 0, 0)),
        scratch_shapes=[
            pltpu.VMEM((n_blk, 1, length), jnp.float32),          # running channel max
            pltpu.VMEM((n_blk, 1, length), jnp.float32),          # running channel sum
        ],
        compiler_params=pltpu.CompilerParams(
            dimension_semantics=("parallel", "arbitrary"),
            vmem_limit_bytes=vmem_limit),
    )(x, w)

    # ---- Kernel 2 (micro): bias + global BN + ReLU + sigmoid -> (N, 1, L) gate ----
    gate = pl.pallas_call(
        _bn_gate_kernel,
        out_shape=jax.ShapeDtypeStruct((n, 1, length), jnp.float32),
        in_specs=[
            pl.BlockSpec(memory_space=pltpu.MemorySpace.VMEM),
            pl.BlockSpec(memory_space=pltpu.MemorySpace.SMEM),    # [bias, gamma, beta]
        ],
        out_specs=pl.BlockSpec(memory_space=pltpu.MemorySpace.VMEM),
        compiler_params=pltpu.CompilerParams(vmem_limit_bytes=vmem_limit),
    )(conv_out, params)

    # ---- Kernel 3: out = x * gate; lane-dense restructure when L % 128 != 0 ----
    g = 1
    if length % 128 != 0:
        g_cand = 128 // math.gcd(length, 128)
        if c % g_cand == 0:
            g = g_cand
    if g > 1:
        # Free reshape: fold g channels onto the lane axis -> lane width g*L (mult. of
        # 128) so stores are full-width vst; the tiny gate is tiled g times to match.
        lane = g * length
        x_in = x.reshape(n, c // g, lane)
        gate_in = jnp.tile(gate[:, 0, :], (1, g)).reshape(n, 1, lane)
        mid = c // g
    else:
        lane = length
        x_in = x
        gate_in = gate
        mid = c

    n_blk2, mid_blk = _pick_apply_tiles(n, mid, lane, itemsize, budget, align)
    out = pl.pallas_call(
        _apply_kernel,
        out_shape=jax.ShapeDtypeStruct((n, mid, lane), x.dtype),
        grid=(n // n_blk2, mid // mid_blk),
        in_specs=[
            pl.BlockSpec((n_blk2, mid_blk, lane), lambda ni, ci: (ni, ci, 0)),
            pl.BlockSpec((n_blk2, 1, lane), lambda ni, ci: (ni, 0, 0)),
        ],
        out_specs=pl.BlockSpec((n_blk2, mid_blk, lane), lambda ni, ci: (ni, ci, 0)),
        compiler_params=pltpu.CompilerParams(
            dimension_semantics=("parallel", "parallel"),         # megacore-shardable
            vmem_limit_bytes=vmem_limit),
    )(x_in, gate_in)
    return out.reshape(n, c, length)


def spatial_gate_reference(x, conv_w, conv_b, bn_gamma, bn_beta):
    """Pure-JAX reference mirroring the PyTorch forward (train-mode BN)."""
    x = x.astype(jnp.float32)
    x_max = jnp.max(x, axis=1, keepdims=True)
    x_mean = jnp.mean(x, axis=1, keepdims=True)
    xc = jnp.concatenate([x_max, x_mean], axis=1)               # (N, 2, L)
    left = LEFT_PAD
    conv = jax.lax.conv_general_dilated(
        xc, conv_w, window_strides=(1,),
        padding=[(left, KERNEL_SIZE - 1 - left)],
        dimension_numbers=("NCH", "OIH", "NCH"),
        precision=jax.lax.Precision.HIGHEST) + conv_b[None, :, None]
    mu = jnp.mean(conv)
    var = jnp.mean((conv - mu) ** 2)
    bn = (conv - mu) / jnp.sqrt(var + BN_EPS) * bn_gamma[None, :, None] + bn_beta[None, :, None]
    gate = jnp.maximum(bn, 0.0)
    scale = 1.0 / (1.0 + jnp.exp(-gate))
    return x * scale


if __name__ == "__main__":
    key = jax.random.PRNGKey(0)
    kx, kw, kb = jax.random.split(key, 3)

    N, C, L = 2, 4, 32
    x = jax.random.normal(kx, (N, C, L), dtype=jnp.float32)

    # Conv1d(2, 1, kernel_size=8) -> weight (1, 2, 8), bias (1,)
    fan_in = 2 * KERNEL_SIZE
    bound = 1.0 / (fan_in ** 0.5)
    conv_w = jax.random.uniform(kw, (1, 2, KERNEL_SIZE), jnp.float32, -bound, bound)
    conv_b = jax.random.uniform(kb, (1,), jnp.float32, -bound, bound)
    # BatchNorm1d(1) default affine init
    bn_gamma = jnp.ones((1,), jnp.float32)
    bn_beta = jnp.zeros((1,), jnp.float32)

    out = jax.block_until_ready(spatial_gate(x, conv_w, conv_b, bn_gamma, bn_beta))
    ref = jax.block_until_ready(spatial_gate_reference(x, conv_w, conv_b, bn_gamma, bn_beta))

    assert out.shape == x.shape and out.dtype == x.dtype
    if not jnp.allclose(out, ref, atol=1e-4, rtol=1e-4):
        raise AssertionError(f"mismatch, max abs err = {jnp.max(jnp.abs(out - ref))}")
    print("KERNEL_OK")
</pallas_src>

<mosaic_0001>
module attributes {stable_mosaic.version = 11 : i64} {
  func.func @kernel(%arg0: i32, %arg1: i32, %arg2: memref<1x4x32xf32, #tpu.memory_space<vmem>>, %arg3: memref<2x8xf32, #tpu.memory_space<smem>>, %arg4: memref<1x1x32xf32, #tpu.memory_space<vmem>>, %arg5: memref<1x1x32xf32, #tpu.memory_space<vmem>>, %arg6: memref<1x1x32xf32, #tpu.memory_space<vmem>>) attributes {dimension_semantics = [#tpu.dimension_semantics<parallel>, #tpu.dimension_semantics<arbitrary>], iteration_bounds = array<i64: 2, 1>, scalar_prefetch = 0 : i64, scratch_operands = 2 : i64, tpu.core_type = #tpu.core_type<tc>, window_params = [{transform_indices = @transform_0, window_bounds = array<i64: 1, 4, 32>}, {transform_indices = @transform_1, window_bounds = array<i64: 2, 8>}, {transform_indices = @transform_2, window_bounds = array<i64: 1, 1, 32>}]} {
    %c0_i32 = arith.constant 0 : i32
    %0 = arith.cmpi eq, %arg1, %c0_i32 : i32
    %1 = arith.extui %0 : i1 to i32
    %c0_i32_0 = arith.constant 0 : i32
    %2 = arith.cmpi ne, %1, %c0_i32_0 : i32
    scf.if %2 {
      %cst_18 = arith.constant 0xFF800000 : f32
      %17 = vector.broadcast %cst_18 : f32 to vector<1x1x32xf32>
      %c0_19 = arith.constant 0 : index
      %c0_20 = arith.constant 0 : index
      %c0_21 = arith.constant 0 : index
      %18 = vector.load %arg5[%c0_19, %c0_20, %c0_21] : memref<1x1x32xf32, #tpu.memory_space<vmem>>, vector<1x1x32xf32>
      tpu.vector_store %arg5[%c0_19, %c0_20, %c0_21], %17 {strides = array<i32>} : memref<1x1x32xf32, #tpu.memory_space<vmem>>, vector<1x1x32xf32>,
      %cst_22 = arith.constant 0.000000e+00 : f32
      %19 = vector.broadcast %cst_22 : f32 to vector<1x1x32xf32>
      %c0_23 = arith.constant 0 : index
      %c0_24 = arith.constant 0 : index
      %c0_25 = arith.constant 0 : index
      %20 = vector.load %arg6[%c0_23, %c0_24, %c0_25] : memref<1x1x32xf32, #tpu.memory_space<vmem>>, vector<1x1x32xf32>
      tpu.vector_store %arg6[%c0_23, %c0_24, %c0_25], %19 {strides = array<i32>} : memref<1x1x32xf32, #tpu.memory_space<vmem>>, vector<1x1x32xf32>,
    } else {
    }
    %c0 = arith.constant 0 : index
    %c0_1 = arith.constant 0 : index
    %c0_2 = arith.constant 0 : index
    %3 = vector.load %arg2[%c0, %c0_1, %c0_2] : memref<1x4x32xf32, #tpu.memory_space<vmem>>, vector<1x4x32xf32>
    %c0_3 = arith.constant 0 : index
    %c0_4 = arith.constant 0 : index
    %c0_5 = arith.constant 0 : index
    %4 = vector.load %arg5[%c0_3, %c0_4, %c0_5] : memref<1x1x32xf32, #tpu.memory_space<vmem>>, vector<1x1x32xf32>
    %cst = arith.constant dense<0xFF800000> : vector<1x32xf32>
    %5 = vector.multi_reduction <maximumf>, %3, %cst [1] : vector<1x4x32xf32> to vector<1x32xf32>
    %6 = vector.shape_cast %5 : vector<1x32xf32> to vector<1x1x32xf32>
    %7 = arith.maximumf %4, %6 : vector<1x1x32xf32>
    %c0_6 = arith.constant 0 : index
    %c0_7 = arith.constant 0 : index
    %c0_8 = arith.constant 0 : index
    %8 = vector.load %arg5[%c0_6, %c0_7, %c0_8] : memref<1x1x32xf32, #tpu.memory_space<vmem>>, vector<1x1x32xf32>
    tpu.vector_store %arg5[%c0_6, %c0_7, %c0_8], %7 {strides = array<i32>} : memref<1x1x32xf32, #tpu.memory_space<vmem>>, vector<1x1x32xf32>,
    %c0_9 = arith.constant 0 : index
    %c0_10 = arith.constant 0 : index
    %c0_11 = arith.constant 0 : index
    %9 = vector.load %arg6[%c0_9, %c0_10, %c0_11] : memref<1x1x32xf32, #tpu.memory_space<vmem>>, vector<1x1x32xf32>
    %cst_12 = arith.constant dense<0.000000e+00> : vector<1x32xf32>
    %10 = vector.multi_reduction <add>, %3, %cst_12 [1] : vector<1x4x32xf32> to vector<1x32xf32>
    %11 = vector.shape_cast %10 : vector<1x32xf32> to vector<1x1x32xf32>
    %12 = arith.addf %9, %11 : vector<1x1x32xf32>
    %c0_13 = arith.constant 0 : index
    %c0_14 = arith.constant 0 : index
    %c0_15 = arith.constant 0 : index
    %13 = vector.load %arg6[%c0_13, %c0_14, %c0_15] : memref<1x1x32xf32, #tpu.memory_space<vmem>>, vector<1x1x32xf32>
    tpu.vector_store %arg6[%c0_13, %c0_14, %c0_15], %12 {strides = array<i32>} : memref<1x1x32xf32, #tpu.memory_space<vmem>>, vector<1x1x32xf32>,
    %c0_i32_16 = arith.constant 0 : i32
    %14 = arith.cmpi eq, %arg1, %c0_i32_16 : i32
    %15 = arith.extui %14 : i1 to i32
    %c0_i32_17 = arith.constant 0 : i32
    %16 = arith.cmpi ne, %15, %c0_i32_17 : i32
    scf.if %16 {
      %c0_18 = arith.constant 0 : index
      %c0_19 = arith.constant 0 : index
      %c0_20 = arith.constant 0 : index
      %17 = vector.load %arg5[%c0_18, %c0_19, %c0_20] : memref<1x1x32xf32, #tpu.memory_space<vmem>>, vector<1x1x32xf32>
      %c0_21 = arith.constant 0 : index
      %c0_22 = arith.constant 0 : index
      %c0_23 = arith.constant 0 : index
      %18 = vector.load %arg6[%c0_21, %c0_22, %c0_23] : memref<1x1x32xf32, #tpu.memory_space<vmem>>, vector<1x1x32xf32>
      %cst_24 = arith.constant 2.500000e-01 : f32
      %19 = vector.broadcast %cst_24 : f32 to vector<1x1x32xf32>
      %20 = arith.mulf %18, %19 : vector<1x1x32xf32>
      %21 = tpu.iota {dimensions = array<i32: 2>} : vector<1x1x32xi32>
      %cst_25 = arith.constant 0.000000e+00 : f32
      %22 = vector.broadcast %cst_25 : f32 to vector<1x1x32xf32>
      %c0_26 = arith.constant 0 : index
      %c0_27 = arith.constant 0 : index
      %23 = memref.load %arg3[%c0_26, %c0_27] : memref<2x8xf32, #tpu.memory_space<smem>>
      %24 = vector.broadcast %23 : f32 to vector<1x1x32xf32>
      %25 = arith.mulf %17, %24 : vector<1x1x32xf32>
      %c1 = arith.constant 1 : index
      %c0_28 = arith.constant 0 : index
      %26 = memref.load %arg3[%c1, %c0_28] : memref<2x8xf32, #tpu.memory_space<smem>>
      %27 = vector.broadcast %26 : f32 to vector<1x1x32xf32>
      %28 = arith.mulf %20, %27 : vector<1x1x32xf32>
      %29 = arith.addf %25, %28 : vector<1x1x32xf32>
      %c3_i32 = arith.constant 3 : i32
      %30 = tpu.dynamic_rotate %29 by %c3_i32 dim 2 : vector<1x1x32xf32>, i32 -> vector<1x1x32xf32>
      %c3_i32_29 = arith.constant 3 : i32
      %31 = vector.broadcast %c3_i32_29 : i32 to vector<1x1x32xi32>
      %32 = arith.cmpi sge, %21, %31 : vector<1x1x32xi32>
      %c32_i32 = arith.constant 32 : i32
      %33 = vector.broadcast %c32_i32 : i32 to vector<1x1x32xi32>
      %34 = arith.cmpi slt, %21, %33 : vector<1x1x32xi32>
      %35 = arith.andi %32, %34 : vector<1x1x32xi1>
      %cst_30 = arith.constant 0.000000e+00 : f32
      %36 = vector.broadcast %cst_30 : f32 to vector<1x1x32xf32>
      %37 = arith.select %35, %30, %36 : vector<1x1x32xi1>, vector<1x1x32xf32>
      %38 = arith.addf %22, %37 : vector<1x1x32xf32>
      %c0_31 = arith.constant 0 : index
      %c1_32 = arith.constant 1 : index
      %39 = memref.load %arg3[%c0_31, %c1_32] : memref<2x8xf32, #tpu.memory_space<smem>>
      %40 = vector.broadcast %39 : f32 to vector<1x1x32xf32>
      %41 = arith.mulf %17, %40 : vector<1x1x32xf32>
      %c1_33 = arith.constant 1 : index
      %c1_34 = arith.constant 1 : index
      %42 = memref.load %arg3[%c1_33, %c1_34] : memref<2x8xf32, #tpu.memory_space<smem>>
      %43 = vector.broadcast %42 : f32 to vector<1x1x32xf32>
      %44 = arith.mulf %20, %43 : vector<1x1x32xf32>
      %45 = arith.addf %41, %44 : vector<1x1x32xf32>
      %c2_i32 = arith.constant 2 : i32
      %46 = tpu.dynamic_rotate %45 by %c2_i32 dim 2 : vector<1x1x32xf32>, i32 -> vector<1x1x32xf32>
      %c2_i32_35 = arith.constant 2 : i32
      %47 = vector.broadcast %c2_i32_35 : i32 to vector<1x1x32xi32>
      %48 = arith.cmpi sge, %21, %47 : vector<1x1x32xi32>
      %c32_i32_36 = arith.constant 32 : i32
      %49 = vector.broadcast %c32_i32_36 : i32 to vector<1x1x32xi32>
      %50 = arith.cmpi slt, %21, %49 : vector<1x1x32xi32>
      %51 = arith.andi %48, %50 : vector<1x1x32xi1>
      %cst_37 = arith.constant 0.000000e+00 : f32
      %52 = vector.broadcast %cst_37 : f32 to vector<1x1x32xf32>
      %53 = arith.select %51, %46, %52 : vector<1x1x32xi1>, vector<1x1x32xf32>
      %54 = arith.addf %38, %53 : vector<1x1x32xf32>
      %c0_38 = arith.constant 0 : index
      %c2 = arith.constant 2 : index
      %55 = memref.load %arg3[%c0_38, %c2] : memref<2x8xf32, #tpu.memory_space<smem>>
      %56 = vector.broadcast %55 : f32 to vector<1x1x32xf32>
      %57 = arith.mulf %17, %56 : vector<1x1x32xf32>
      %c1_39 = arith.constant 1 : index
      %c2_40 = arith.constant 2 : index
      %58 = memref.load %arg3[%c1_39, %c2_40] : memref<2x8xf32, #tpu.memory_space<smem>>
      %59 = vector.broadcast %58 : f32 to vector<1x1x32xf32>
      %60 = arith.mulf %20, %59 : vector<1x1x32xf32>
      %61 = arith.addf %57, %60 : vector<1x1x32xf32>
      %c1_i32 = arith.constant 1 : i32
      %62 = tpu.dynamic_rotate %61 by %c1_i32 dim 2 : vector<1x1x32xf32>, i32 -> vector<1x1x32xf32>
      %c1_i32_41 = arith.constant 1 : i32
      %63 = vector.broadcast %c1_i32_41 : i32 to vector<1x1x32xi32>
      %64 = arith.cmpi sge, %21, %63 : vector<1x1x32xi32>
      %c32_i32_42 = arith.constant 32 : i32
      %65 = vector.broadcast %c32_i32_42 : i32 to vector<1x1x32xi32>
      %66 = arith.cmpi slt, %21, %65 : vector<1x1x32xi32>
      %67 = arith.andi %64, %66 : vector<1x1x32xi1>
      %cst_43 = arith.constant 0.000000e+00 : f32
      %68 = vector.broadcast %cst_43 : f32 to vector<1x1x32xf32>
      %69 = arith.select %67, %62, %68 : vector<1x1x32xi1>, vector<1x1x32xf32>
      %70 = arith.addf %54, %69 : vector<1x1x32xf32>
      %c0_44 = arith.constant 0 : index
      %c3 = arith.constant 3 : index
      %71 = memref.load %arg3[%c0_44, %c3] : memref<2x8xf32, #tpu.memory_space<smem>>
      %72 = vector.broadcast %71 : f32 to vector<1x1x32xf32>
      %73 = arith.mulf %17, %72 : vector<1x1x32xf32>
      %c1_45 = arith.constant 1 : index
      %c3_46 = arith.constant 3 : index
      %74 = memref.load %arg3[%c1_45, %c3_46] : memref<2x8xf32, #tpu.memory_space<smem>>
      %75 = vector.broadcast %74 : f32 to vector<1x1x32xf32>
      %76 = arith.mulf %20, %75 : vector<1x1x32xf32>
      %77 = arith.addf %73, %76 : vector<1x1x32xf32>
      %78 = arith.addf %70, %77 : vector<1x1x32xf32>
      %c0_47 = arith.constant 0 : index
      %c4 = arith.constant 4 : index
      %79 = memref.load %arg3[%c0_47, %c4] : memref<2x8xf32, #tpu.memory_space<smem>>
      %80 = vector.broadcast %79 : f32 to vector<1x1x32xf32>
      %81 = arith.mulf %17, %80 : vector<1x1x32xf32>
      %c1_48 = arith.constant 1 : index
      %c4_49 = arith.constant 4 : index
      %82 = memref.load %arg3[%c1_48, %c4_49] : memref<2x8xf32, #tpu.memory_space<smem>>
      %83 = vector.broadcast %82 : f32 to vector<1x1x32xf32>
      %84 = arith.mulf %20, %83 : vector<1x1x32xf32>
      %85 = arith.addf %81, %84 : vector<1x1x32xf32>
      %c31_i32 = arith.constant 31 : i32
      %86 = tpu.dynamic_rotate %85 by %c31_i32 dim 2 : vector<1x1x32xf32>, i32 -> vector<1x1x32xf32>
      %c0_i32_50 = arith.constant 0 : i32
      %87 = vector.broadcast %c0_i32_50 : i32 to vector<1x1x32xi32>
      %88 = arith.cmpi sge, %21, %87 : vector<1x1x32xi32>
      %c31_i32_51 = arith.constant 31 : i32
      %89 = vector.broadcast %c31_i32_51 : i32 to vector<1x1x32xi32>
      %90 = arith.cmpi slt, %21, %89 : vector<1x1x32xi32>
      %91 = arith.andi %88, %90 : vector<1x1x32xi1>
      %cst_52 = arith.constant 0.000000e+00 : f32
      %92 = vector.broadcast %cst_52 : f32 to vector<1x1x32xf32>
      %93 = arith.select %91, %86, %92 : vector<1x1x32xi1>, vector<1x1x32xf32>
      %94 = arith.addf %78, %93 : vector<1x1x32xf32>
      %c0_53 = arith.constant 0 : index
      %c5 = arith.constant 5 : index
      %95 = memref.load %arg3[%c0_53, %c5] : memref<2x8xf32, #tpu.memory_space<smem>>
      %96 = vector.broadcast %95 : f32 to vector<1x1x32xf32>
      %97 = arith.mulf %17, %96 : vector<1x1x32xf32>
      %c1_54 = arith.constant 1 : index
      %c5_55 = arith.constant 5 : index
      %98 = memref.load %arg3[%c1_54, %c5_55] : memref<2x8xf32, #tpu.memory_space<smem>>
      %99 = vector.broadcast %98 : f32 to vector<1x1x32xf32>
      %100 = arith.mulf %20, %99 : vector<1x1x32xf32>
      %101 = arith.addf %97, %100 : vector<1x1x32xf32>
      %c30_i32 = arith.constant 30 : i32
      %102 = tpu.dynamic_rotate %101 by %c30_i32 dim 2 : vector<1x1x32xf32>, i32 -> vector<1x1x32xf32>
      %c0_i32_56 = arith.constant 0 : i32
      %103 = vector.broadcast %c0_i32_56 : i32 to vector<1x1x32xi32>
      %104 = arith.cmpi sge, %21, %103 : vector<1x1x32xi32>
      %c30_i32_57 = arith.constant 30 : i32
      %105 = vector.broadcast %c30_i32_57 : i32 to vector<1x1x32xi32>
      %106 = arith.cmpi slt, %21, %105 : vector<1x1x32xi32>
      %107 = arith.andi %104, %106 : vector<1x1x32xi1>
      %cst_58 = arith.constant 0.000000e+00 : f32
      %108 = vector.broadcast %cst_58 : f32 to vector<1x1x32xf32>
      %109 = arith.select %107, %102, %108 : vector<1x1x32xi1>, vector<1x1x32xf32>
      %110 = arith.addf %94, %109 : vector<1x1x32xf32>
      %c0_59 = arith.constant 0 : index
      %c6 = arith.constant 6 : index
      %111 = memref.load %arg3[%c0_59, %c6] : memref<2x8xf32, #tpu.memory_space<smem>>
      %112 = vector.broadcast %111 : f32 to vector<1x1x32xf32>
      %113 = arith.mulf %17, %112 : vector<1x1x32xf32>
      %c1_60 = arith.constant 1 : index
      %c6_61 = arith.constant 6 : index
      %114 = memref.load %arg3[%c1_60, %c6_61] : memref<2x8xf32, #tpu.memory_space<smem>>
      %115 = vector.broadcast %114 : f32 to vector<1x1x32xf32>
      %116 = arith.mulf %20, %115 : vector<1x1x32xf32>
      %117 = arith.addf %113, %116 : vector<1x1x32xf32>
      %c29_i32 = arith.constant 29 : i32
      %118 = tpu.dynamic_rotate %117 by %c29_i32 dim 2 : vector<1x1x32xf32>, i32 -> vector<1x1x32xf32>
      %c0_i32_62 = arith.constant 0 : i32
      %119 = vector.broadcast %c0_i32_62 : i32 to vector<1x1x32xi32>
      %120 = arith.cmpi sge, %21, %119 : vector<1x1x32xi32>
      %c29_i32_63 = arith.constant 29 : i32
      %121 = vector.broadcast %c29_i32_63 : i32 to vector<1x1x32xi32>
      %122 = arith.cmpi slt, %21, %121 : vector<1x1x32xi32>
      %123 = arith.andi %120, %122 : vector<1x1x32xi1>
      %cst_64 = arith.constant 0.000000e+00 : f32
      %124 = vector.broadcast %cst_64 : f32 to vector<1x1x32xf32>
      %125 = arith.select %123, %118, %124 : vector<1x1x32xi1>, vector<1x1x32xf32>
      %126 = arith.addf %110, %125 : vector<1x1x32xf32>
      %c0_65 = arith.constant 0 : index
      %c7 = arith.constant 7 : index
      %127 = memref.load %arg3[%c0_65, %c7] : memref<2x8xf32, #tpu.memory_space<smem>>
      %128 = vector.broadcast %127 : f32 to vector<1x1x32xf32>
      %129 = arith.mulf %17, %128 : vector<1x1x32xf32>
      %c1_66 = arith.constant 1 : index
      %c7_67 = arith.constant 7 : index
      %130 = memref.load %arg3[%c1_66, %c7_67] : memref<2x8xf32, #tpu.memory_space<smem>>
      %131 = vector.broadcast %130 : f32 to vector<1x1x32xf32>
      %132 = arith.mulf %20, %131 : vector<1x1x32xf32>
      %133 = arith.addf %129, %132 : vector<1x1x32xf32>
      %c28_i32 = arith.constant 28 : i32
      %134 = tpu.dynamic_rotate %133 by %c28_i32 dim 2 : vector<1x1x32xf32>, i32 -> vector<1x1x32xf32>
      %c0_i32_68 = arith.constant 0 : i32
      %135 = vector.broadcast %c0_i32_68 : i32 to vector<1x1x32xi32>
      %136 = arith.cmpi sge, %21, %135 : vector<1x1x32xi32>
      %c28_i32_69 = arith.constant 28 : i32
      %137 = vector.broadcast %c28_i32_69 : i32 to vector<1x1x32xi32>
      %138 = arith.cmpi slt, %21, %137 : vector<1x1x32xi32>
      %139 = arith.andi %136, %138 : vector<1x1x32xi1>
      %cst_70 = arith.constant 0.000000e+00 : f32
      %140 = vector.broadcast %cst_70 : f32 to vector<1x1x32xf32>
      %141 = arith.select %139, %134, %140 : vector<1x1x32xi1>, vector<1x1x32xf32>
      %142 = arith.addf %126, %141 : vector<1x1x32xf32>
      %c0_71 = arith.constant 0 : index
      %c0_72 = arith.constant 0 : index
      %c0_73 = arith.constant 0 : index
      %143 = vector.load %arg4[%c0_71, %c0_72, %c0_73] : memref<1x1x32xf32, #tpu.memory_space<vmem>>, vector<1x1x32xf32>
      tpu.vector_store %arg4[%c0_71, %c0_72, %c0_73], %142 {strides = array<i32>} : memref<1x1x32xf32, #tpu.memory_space<vmem>>, vector<1x1x32xf32>,
    } else {
    }
    return
  }
  func.func @transform_0(%arg0: i32, %arg1: i32) -> (i32, i32, i32) {
    %c0_i32 = arith.constant 0 : i32
    %c0_i32_0 = arith.constant 0 : i32
    return %arg0, %arg1, %c0_i32 : i32, i32, i32
  }
  func.func @transform_1(%arg0: i32, %arg1: i32) -> (i32, i32) {
    %c0_i32 = arith.constant 0 : i32
    %c0_i32_0 = arith.constant 0 : i32
    %c0_i32_1 = arith.constant 0 : i32
    return %c0_i32, %c0_i32_0 : i32, i32
  }
  func.func @transform_2(%arg0: i32, %arg1: i32) -> (i32, i32, i32) {
    %c0_i32 = arith.constant 0 : i32
    %c0_i32_0 = arith.constant 0 : i32
    %c0_i32_1 = arith.constant 0 : i32
    return %arg0, %c0_i32, %c0_i32_0 : i32, i32, i32
  }
}

</mosaic_0001>

<bundles_post_ra>
// kernel: tpu_custom_call.1
= control target key start
LH: loop header
LB: loop body
LE: loop exit
PB: predicated region body
PF: predicated region fallthrough
CT: control target
= control target key end

     0   :  { %7 = vsyncpa [#allocation5], 0  ;;  %s992_s0 = inlined_call_operand.hbm [shape: f32[2,4,32], index: 0, kind: input, shape index: {}]   ;;  %s993_s1 = inlined_call_operand.hbm [shape: f32[2,8], index: 1, kind: input, shape index: {}]   ;;  %s994_s2 = inlined_call_operand.hbm [shape: f32[2,1,32], index: 2, kind: output, shape index: {}]  }
   0x1   :  { %9 = vsyncpa [#allocation5 + $0x1], 0 }
   0x2   :  { %10 = vsyncpa [#allocation7], 0 }
   0x3   :  { %11 = vsyncpa [#allocation6], 0 }
   0x4   :  { %13 = vsyncpa [#allocation6 + $0x1], 0  ;;  %s746_s9 = smov 0   ;;  %s748_s10 = smov 0  }
   0x5   :  { %s750_s11 = smov 0   ;;  %s752_s12 = smov 0  }
   0x6   :  { %s754_s13 = smov 0   ;;  %s756_s14 = smov 0  }
   0x7 LB: > { %s482_s15 = sadd.s32 4294967295, %s716_s14   ;;  %s483_s16 = sadd.s32 4294967294, %s716_s14   ;;  %s716_s14 = sphi %s756_s14, %s19_s14   ;;  %s712_s13 = sphi %s754_s13, %s1011_s13   ;;  %s708_s12 = sphi %s752_s12, %s1010_s12   ;;  %s704_s11 = sphi %s750_s11, %s1009_s11   ;;  %s700_s10 = sphi %s748_s10, %s1008_s10   ;;  %s696_s9 = sphi %s746_s9, %s1007_s9  }
   0x8   : > { %p53_p0 = scmp.ne.s32.totalorder %s700_s10, %s696_s9  ;;  %p780_p1 = scmp.eq.s32.totalorder %s482_s15, 0 }
   0x9   : > { %p784_p2 = scmp.eq.s32.totalorder %s482_s15, 1  ;;  %p104_p3 = scmp.eq.s32.totalorder %s483_s16, 1 }
   0xa   : > { %p790_p4 = por %p780_p1, %p53_p0  ;;  %p484_p5 = scmp.ge.s32.totalorder %s716_s14, 1 }
   0xb   : > { %p795_p6 = por %p104_p3, %p53_p0  ;;  %p111_p7 = scmp.lt.s32.totalorder %s716_s14, 3 }
   0xc   : > { %s31_s22 = sadd.s32 1, %s712_s13  ;;  %s40_s23 = sadd.s32 1, %s704_s11 }
   0xd   : > { %s999_s20 = scalar_select %p795_p6, 1, 0 }
   0xe   : > { %p800_p8 = pnand %p484_p5, %p111_p7  ;;  %p33_p12 = scmp.ge.s32.totalorder %s31_s22, 2 }
   0xf   : > { %p47_p13 = scmp.ne.s32.totalorder %s704_s11, %s700_s10  ;;  %p48_p0 = scmp.eq.s32.totalorder %s716_s14, 0 }
  0x10   : > { %p518_p10 = pneg %p800_p8  ;;  %s718_s24 = smov [#allocation8]  }
  0x11   : > { %s1013_s22 = smov (%p33_p12, %s31_s22), 0  ;;  %p819_p3 = por %p48_p0, %p47_p13 }
  0x12   : > { %p519_p11 = pnand %p518_p10, %p780_p1  ;;  %p825_p5 = por %p784_p2, %p47_p13 }
  0x13   : > { %s35_s29 = ssub.s32 %s712_s13, %s1013_s22  ;;  %p531_p7 = scmp.lt.s32.totalorder %s716_s14, 2 }
  0x14   : > { %521 = dma.hbm_to_smem (!%p519_p11), %s993_s1, 32, %s718_s24, [#allocation7]  }
  0x15   : > { %s1002_s28 = scalar_select %p825_p5, 1, 0 }
  0x16   : > { %p38_p10 = scmp.eq.s32.totalorder %s35_s29, 0  ;;  %s133_s30 = sand.u32 1, %s704_s11  }
  0x17   : > { %s487_s3 = sshll.u32 %s133_s30, 2  ;;  %s488_s5 = sshll.u32 %s712_s13, 6 }
  0x18   : > { %s834_s4 = scalar_select %p38_p10, %s704_s11, %s40_s23  }
  0x19   : > { %s143_s8 = scalar_lea.hbm %s992_s0, %s488_s5  ;;  %s137_s15 = scalar_lea.vmem [#allocation4], %s487_s3 }
  0x1a   : > { %s145_s16 = sshll.u32 %s137_s15, 4  ;;  %p842_p2 = pnand %p531_p7, %p819_p3  ;;  %s146_s16 = int_to_ptr.vmem [resolvable:$true] %s145_s16 }
  0x1b   : > { %s134_s24 = scalar_lea.sflag [#allocation5], %s133_s30  ;;  %s617_s25 = scalar_lea.vmem %s146_s16, 64 }
  0x1c   : > { %p606_p11 = pneg %p842_p2  ;;  %p618_p12 = scmp.ne.s32.totalorder %s146_s16, %s617_s25 }
  0x1d   : > { %s719_s23 = smov [#allocation4]  }
  0x1e   : > { %p620_p13 = pnand %p618_p12, %p606_p11  ;;  %s622_s26 = sshll.u32 %s719_s23, 4  ;;  %s623_s26 = int_to_ptr.vmem [resolvable:$false] %s622_s26 }
  0x1f   : > { %s624_s29 = scalar_lea.vmem %s623_s26, 128  ;;  %p625_p10 = scmp.lt.s32.totalorder %s146_s16, %s623_s26 }
  0x20   : > { %p621_p0 = pneg %p620_p13  ;;  %p626_p9 = scmp.lt.s32.totalorder %s624_s29, %s617_s25 }
  0x22   : > { %p627_p6 = por %p626_p9, %p625_p10 }
  0x24   : > { %p628_p5 = pnand %p627_p6, %p621_p0 }
  0x26   : > { %631 = shalt.err (!%p628_p5)
}
  0x27   : > { %525 = dma.hbm_to_vmem [thread:$0]  (!%p842_p2), %s143_s8, 64, %s146_s16, %s134_s24  }
  0x28   : > { %154 = sbr.rel (%p800_p8) target bundleno = 459 (0x1cb), region = 28  ;;  %s853_s27 = sand.u32 (!%p800_p8), 1, %s700_s10  }
  0x29   : > { %s490_s30 = sshll.u32 (!%p800_p8), %s853_s27, 2  ;;  %s157_s3 = scalar_lea.sflag (!%p800_p8), [#allocation5], %s853_s27 }
  0x2a   : > { %s160_s5 = scalar_lea.vmem (!%p800_p8), [#allocation4], %s490_s30 }
  0x2d   : > { %683 = dma.done.wait (%p790_p4), %s157_s3, 64  }
  0x2e   : > { %685 = vsyncadd (%p790_p4), %s157_s3, 4294967232 }
  0x2f   : > { %687 = dma.done.wait (%p780_p1), [#allocation7], 32  }
  0x30   : > { %689 = vsyncadd (%p780_p1), [#allocation7], 4294967264 }
  0x31   : > { %169 = sfence }
  0x32   : > { %vm189_vm0 = vcmask 253952   ;;  %v192_v0 = vld [vmem:[%s160_s5] sm:$0xf]  ;;  %vm194_vm1 = vcmask 257024   ;;  %v720_v1 = vmov -inf   ;;  %v721_v2 = vmov 0.0  }
  0x33   : > { %190 = vst.msk [vmem:[#allocation2] sm:$0x1] %vm189_vm0, %v720_v1  ;;  %191 = vst.msk [vmem:[#allocation3] sm:$0x1] %vm189_vm0, %v721_v2  ;;  %v195_v3 = vsel %vm194_vm1, %v192_v0, -inf  ;;  %v206_v4 = vsel %vm194_vm1, %v192_v0, 0.0 }
  0x34   : > { %v196_v5 = vrot.slane %v195_v3, 4  ;;  %v207_v6 = vrot.slane %v206_v4, 4  ;;  %s867_s17 = sld [smem:[#allocation8]]  ;;  %s722_s30 = smov 32   ;;  %vm230_vm2 = vcmask 1047808  }
  0x35   : > { %s869_s19 = sld [smem:[#allocation8 + $0x80]]  ;;  %s723_s3 = smov 99  }
  0x36   : > { %v197_v7 = vmax.f32 %v195_v3, %v196_v5  ;;  %v208_v8 = vadd.f32 %v207_v6, %v206_v4  ;;  %s871_s21 = sld [smem:[#allocation8 + $0x1]]  ;;  %s724_s5 = smov 98  }
  0x37   : > { %s873_s6 = sld [smem:[#allocation8 + $0x81]]  ;;  %p1004_p4 = scmp.ne.s32.totalorder %s1002_s28, 0 }
  0x38   : > { %v198_v9 = vrot.slane %v197_v7, 2  ;;  %v209_v10 = vrot.slane %v208_v8, 2  ;;  %s495_s7 = sld [smem:[#allocation8 + $0x2]] }
  0x39   : > { %s875_s8 = sld [smem:[#allocation8 + $0x82]] }
  0x3a   : > { %v199_v11 = vmax.f32 %v197_v7, %v198_v9  ;;  %v210_v12 = vadd.f32 %v209_v10, %v208_v8  ;;  %v193_v15 = vld [vmem:[#allocation2] sm:$0x1]  ;;  %v205_v16 = vld [vmem:[#allocation3] sm:$0x1]  ;;  %s499_s15 = sld [smem:[#allocation8 + $0x4]]  ;;  %v224_v21 = vstv %s867_s17  ;;  %s725_s17 = smov 97  }
  0x3b   : > { %s500_s16 = sld [smem:[#allocation8 + $0x84]]  ;;  %v227_v27 = vstv %s869_s19  ;;  %s726_s19 = smov 127  }
  0x3c   : > { %v200_v13 = vrot.slane %v199_v11, 1  ;;  %v211_v14 = vrot.slane %v210_v12, 1  ;;  %s877_s18 = sld [smem:[#allocation8 + $0x5]]  ;;  %v247_v23 = vstv %s871_s21  ;;  %s727_s21 = smov 126  }
  0x3d   : > { %s881_s24 = sld [smem:[#allocation8 + $0x85]]  ;;  %v250_v28 = vstv %s873_s6  ;;  %s728_s6 = smov 125  }
  0x3e   : > { %v201_v17 = vmax.f32 %v199_v11, %v200_v13  ;;  %v212_v18 = vadd.f32 %v211_v14, %v210_v12  ;;  %s883_s25 = sld [smem:[#allocation8 + $0x6]]  ;;  %v268_v22 = vstv %s495_s7  ;;  %s729_s7 = smov 124  }
  0x3f   : > { %s885_s23 = sld [smem:[#allocation8 + $0x86]]  ;;  %v271_v29 = vstv %s875_s8 }
  0x40   : > { %v202_v19 = vmax.f32 %v193_v15, %v201_v17  ;;  %v213_v20 = vadd.f32 %v212_v18, %v205_v16  ;;  %v297_v24 = vstv %s499_s15  ;;  %s889_s26 = sld [smem:[#allocation8 + $0x7]] }
  0x41   : > { %v300_v30 = vstv %s500_s16  ;;  %s896_s29 = sld [smem:[#allocation8 + $0x87]]  ;;  %s507_s16 = sshll.u32 %s708_s12, 4 }
  0x42   : > { %204 = vst.msk [vmem:[#allocation2] sm:$0x1] %vm189_vm0, %v202_v19  ;;  %214 = vst.msk [vmem:[#allocation3] sm:$0x1] %vm189_vm0, %v213_v20  ;;  %v319_v34 = vstv %s877_s18  ;;  %s497_s8 = sld [smem:[#allocation8 + $0x3]]  ;;  %s184_s18 = scalar_lea.vmem [#allocation9], %s853_s27 }
  0x43   : > { %v322_v37 = vstv %s881_s24  ;;  %s498_s15 = sld [smem:[#allocation8 + $0x83]]  ;;  %s395_s24 = sshll.u32 %s184_s18, 4  ;;  %s396_s24 = int_to_ptr.vmem [resolvable:$true] %s395_s24 }
  0x44   : > { %v340_v38 = vstv %s883_s25 }
  0x45   : > { %v343_v43 = vstv %s885_s23 }
  0x46   : > { %v361_v52 = vstv %s889_s26  ;;  %s393_s26 = scalar_lea.hbm %s994_s2, %s507_s16 }
  0x47   : > { %v364_v53 = vstv %s896_s29  ;;  %s383_s29 = scalar_lea.sflag [#allocation6], %s853_s27 }
  0x49   : > { %v891_v25 = vld [vmem:[#allocation2] sm:$0x1]  ;;  %v219_v26 = vld [vmem:[#allocation3] sm:$0x1] }
  0x4a   : > { %v898_v31 = vmul.f32 0.25, %v219_v26  ;;  %v225_v32 = vmul.f32 %v224_v21, %v891_v25  ;;  %v269_v33 = vmul.f32 %v268_v22, %v891_v25  ;;  %v248_v35 = vmul.f32 %v247_v23, %v891_v25 }
  0x4b   : > { %v298_v36 = vmul.f32 %v297_v24, %v891_v25  ;;  %v320_v46 = vmul.f32 %v319_v34, %v891_v25  ;;  %v341_v48 = vmul.f32 %v340_v38, %v891_v25  ;;  %v362_v54 = vmul.f32 %v361_v52, %v891_v25 }
  0x4c   : > { %v228_v39 = vmul.f32 %v227_v27, %v898_v31  ;;  %v251_v40 = vmul.f32 %v250_v28, %v898_v31  ;;  %v272_v41 = vmul.f32 %v271_v29, %v898_v31  ;;  %v301_v42 = vmul.f32 %v300_v30, %v898_v31 }
  0x4d   : > { %v323_v47 = vmul.f32 %v322_v37, %v898_v31  ;;  %v344_v51 = vmul.f32 %v343_v43, %v898_v31  ;;  %v365_v57 = vmul.f32 %v364_v53, %v898_v31  ;;  %v221_v23 = vlaneseq }
  0x4e   : > { %v229_v44 = vadd.f32 %v228_v39, %v225_v32  ;;  %v273_v45 = vadd.f32 %v272_v41, %v269_v33  ;;  %v252_v49 = vadd.f32 %v251_v40, %v248_v35  ;;  %v302_v50 = vadd.f32 %v301_v42, %v298_v36 }
  0x4f   : > { %v324_v55 = vadd.f32 %v323_v47, %v320_v46  ;;  %v345_v56 = vadd.f32 %v344_v51, %v341_v48  ;;  %v366_v58 = vadd.f32 %v365_v57, %v362_v54  ;;  %v222_v24 = vand.u32 127, %v221_v23 }
  0x50   : > { %231 = vrot.lane.b32.xlu0 %v229_v44, %s722_s30  ;;  %274 = vrot.lane.b32.xlu1 %v273_v45, %s722_s30  ;;  %v289_v26 = vstv %s497_s8  ;;  %v292_v27 = vstv %s498_s15 }
  0x51   : > { %vm237_vm3 = vcmp.ge.s32.totalorder %v222_v24, 3  ;;  %vm238_vm4 = vcmp.lt.s32.totalorder %v222_v24, 32  ;;  %vm259_vm5 = vcmp.ge.s32.totalorder %v222_v24, 2  ;;  %vm280_vm6 = vcmp.ge.s32.totalorder %v222_v24, 1 }
  0x52   : > { %vm239_vm7 = vmand %vm237_vm3, %vm238_vm4  ;;  %v290_v29 = vmul.f32 %v289_v26, %v891_v25  ;;  %v293_v30 = vmul.f32 %v292_v27, %v898_v31  ;;  %vm310_vm10 = vcmp.lt.s32.totalorder %v222_v24, 31  ;;  %vm331_vm11 = vcmp.lt.s32.totalorder %v222_v24, 30 }
  0x53   : > { %vm260_vm8 = vmand %vm259_vm5, %vm238_vm4  ;;  %vm352_vm12 = vcmp.lt.s32.totalorder %v222_v24, 29  ;;  %vm373_vm13 = vcmp.lt.s32.totalorder %v222_v24, 28 }
  0x54   : > { %253 = vrot.lane.b32.xlu0 %v252_v49, %s722_s30  ;;  %303 = vrot.lane.b32.xlu1 %v302_v50, %s722_s30  ;;  %vm281_vm9 = vmand %vm280_vm6, %vm238_vm4  ;;  %v294_v38 = vadd.f32 %v293_v30, %v290_v29 }
  0x58   : > { %325 = vrot.lane.b32.xlu0 %v324_v55, %s722_s30  ;;  %346 = vrot.lane.b32.xlu1 %v345_v56, %s722_s30 }
  0x5c   : > { %367 = vrot.lane.b32.xlu0 %v366_v58, %s722_s30 }
  0xc2   : > { %v232_v59 = vpop.permute.xlu0 %231  ;;  %v275_v60 = vpop.permute.xlu1 %274 }
  0xc3   : > { %v233_v61 = vsel %vm230_vm2, %v232_v59, %v229_v44  ;;  %v276_v62 = vsel %vm230_vm2, %v275_v60, %v273_v45 }
  0xc4   : > { %234 = vrot.lane.b32.xlu1 %v233_v61, %s722_s30 }
  0xc6   : > { %v254_v63 = vpop.permute.xlu0 %253  ;;  %v304_v0 = vpop.permute.xlu1 %303 }
  0xc7   : > { %v255_v1 = vsel %vm230_vm2, %v254_v63, %v252_v49  ;;  %v305_v2 = vsel %vm230_vm2, %v304_v0, %v302_v50 }
  0xc8   : > { %256 = vrot.lane.b32.xlu0 %v255_v1, %s722_s30  ;;  %277 = vrot.lane.b32.xlu1 %v276_v62, %s722_s30 }
  0xca   : > { %v326_v3 = vpop.permute.xlu0 %325  ;;  %v347_v4 = vpop.permute.xlu1 %346 }
  0xcb   : > { %v327_v5 = vsel %vm230_vm2, %v326_v3, %v324_v55  ;;  %v348_v6 = vsel %vm230_vm2, %v347_v4, %v345_v56 }
  0xcc   : > { %306 = vrot.lane.b32.xlu0 %v305_v2, %s722_s30  ;;  %328 = vrot.lane.b32.xlu1 %v327_v5, %s722_s30 }
  0xce   : > { %v368_v7 = vpop.permute.xlu0 %367 }
  0xcf   : > { %v369_v8 = vsel %vm230_vm2, %v368_v7, %v366_v58 }
  0xd0   : > { %349 = vrot.lane.b32.xlu0 %v348_v6, %s722_s30  ;;  %370 = vrot.lane.b32.xlu1 %v369_v8, %s722_s30  ;;  %s632_s30 = scalar_lea.vmem %s396_s24, 16 }
  0xd1   : > { %p633_p1 = scmp.ne.s32.totalorder %s396_s24, %s632_s30 }
  0xd3   : > { %p634_p6 = pnand %p633_p1, %p1004_p4 }
  0xd5   : > { %p635_p8 = pneg %p634_p6 }
 0x136   : > { %v235_v9 = vpop.permute.xlu1 %234 }
 0x137   : > { %v236_v10 = vsel %vm230_vm2, %v235_v9, %v229_v44 }
 0x138   : > { %241 = vrot.lane.b32.xlu0 %v236_v10, %s723_s3  ;;  %s730_s3 = smov [#allocation9]  }
 0x13a   : > { %v257_v11 = vpop.permute.xlu0 %256  ;;  %v278_v12 = vpop.permute.xlu1 %277 }
 0x13b   : > { %v258_v13 = vsel %vm230_vm2, %v257_v11, %v252_v49  ;;  %v279_v14 = vsel %vm230_vm2, %v278_v12, %v273_v45 }
 0x13c   : > { %262 = vrot.lane.b32.xlu1 %v258_v13, %s724_s5  ;;  %283 = vrot.lane.b32.xlu0 %v279_v14, %s725_s17  ;;  %s636_s5 = sshll.u32 %s730_s3, 4  ;;  %s637_s5 = int_to_ptr.vmem [resolvable:$false] %s636_s5 }
 0x13d   : > { %s638_s12 = scalar_lea.vmem %s637_s5, 32  ;;  %p639_p9 = scmp.lt.s32.totalorder %s396_s24, %s637_s5 }
 0x13e   : > { %v307_v15 = vpop.permute.xlu0 %306  ;;  %v329_v16 = vpop.permute.xlu1 %328  ;;  %p640_p3 = scmp.lt.s32.totalorder %s638_s12, %s632_s30 }
 0x13f   : > { %v308_v17 = vsel %vm230_vm2, %v307_v15, %v302_v50  ;;  %v330_v18 = vsel %vm230_vm2, %v329_v16, %v324_v55 }
 0x140   : > { %313 = vrot.lane.b32.xlu1 %v308_v17, %s726_s19  ;;  %334 = vrot.lane.b32.xlu0 %v330_v18, %s727_s21  ;;  %p641_p5 = por %p640_p3, %p639_p9 }
 0x142   : > { %v350_v19 = vpop.permute.xlu0 %349  ;;  %v371_v20 = vpop.permute.xlu1 %370  ;;  %p642_p7 = pnand %p641_p5, %p635_p8 }
 0x143   : > { %v351_v21 = vsel %vm230_vm2, %v350_v19, %v345_v56  ;;  %v372_v22 = vsel %vm230_vm2, %v371_v20, %v366_v58 }
 0x144   : > { %355 = vrot.lane.b32.xlu1 %v351_v21, %s728_s6  ;;  %376 = vrot.lane.b32.xlu0 %v372_v22, %s729_s7 }
 0x1aa   : > { %v242_v28 = vpop.permute.xlu0 %241 }
 0x1ab   : > { %v244_v34 = vsel %vm239_vm7, %v242_v28, 0.0 }
 0x1ae   : > { %v263_v32 = vpop.permute.xlu1 %262  ;;  %v284_v33 = vpop.permute.xlu0 %283 }
 0x1af   : > { %v265_v35 = vsel %vm260_vm8, %v263_v32, 0.0  ;;  %v286_v36 = vsel %vm281_vm9, %v284_v33, 0.0 }
 0x1b0   : > { %v266_v37 = vadd.f32 %v265_v35, %v244_v34 }
 0x1b2   : > { %v287_v39 = vadd.f32 %v286_v36, %v266_v37  ;;  %v314_v40 = vpop.permute.xlu1 %313  ;;  %v335_v41 = vpop.permute.xlu0 %334 }
 0x1b3   : > { %v316_v42 = vsel %vm310_vm10, %v314_v40, 0.0  ;;  %v337_v25 = vsel %vm331_vm11, %v335_v41, 0.0 }
 0x1b4   : > { %v295_v43 = vadd.f32 %v294_v38, %v287_v39 }
 0x1b6   : > { %v317_v31 = vadd.f32 %v316_v42, %v295_v43  ;;  %v356_v44 = vpop.permute.xlu1 %355  ;;  %v377_v45 = vpop.permute.xlu0 %376 }
 0x1b7   : > { %v358_v46 = vsel %vm352_vm12, %v356_v44, 0.0  ;;  %v379_v48 = vsel %vm373_vm13, %v377_v45, 0.0 }
 0x1b8   : > { %v338_v47 = vadd.f32 %v337_v25, %v317_v31 }
 0x1ba   : > { %v359_v49 = vadd.f32 %v358_v46, %v338_v47 }
 0x1bc   : > { %v380_v50 = vadd.f32 %v379_v48, %v359_v49 }
 0x1be   : > { %381 = vst.msk [vmem:[%s184_s18] sm:$0x1] %vm189_vm0, %v380_v50 }
 0x1bf   : > { %645 = shalt.err (!%p642_p7)
}
 0x1c0   : > { %s646_s17 = scalar_lea.hbm %s393_s26, 16  ;;  %s650_s21 = scalar_lea.hbm %s994_s2, 32 }
 0x1c1   : > { %p647_p2 = scmp.ne.s32.totalorder %s393_s26, %s646_s17  ;;  %p651_p13 = scmp.lt.s32.totalorder %s393_s26, %s994_s2 }
 0x1c2   : > { %p652_p0 = scmp.lt.s32.totalorder %s650_s21, %s646_s17 }
 0x1c3   : > { %p648_p11 = pnand %p647_p2, %p1004_p4 }
 0x1c4   : > { %p653_p10 = por %p652_p0, %p651_p13 }
 0x1c5   : > { %p649_p12 = pneg %p648_p11 }
 0x1c7   : > { %p654_p1 = pnand %p653_p10, %p649_p12 }
 0x1c9   : > { %657 = shalt.err (!%p654_p1)
}
 0x1ca   : > { %516 = dma.vmem_to_hbm [thread:$0]  (%p1004_p4), %s396_s24, 16, %s393_s26, %s383_s29  }
 0x1cb PF: > { %s407_s8 = sand.u32 1, %s696_s9   ;;  %p1005_p6 = scmp.ne.s32.totalorder %s999_s20, 0 }
 0x1cc   : > { %p1006_p8 = scmp.ge.s32.totalorder %s716_s14, 2  ;;  %s408_s15 = scalar_lea.sflag [#allocation6], %s407_s8 }
 0x1ce   : > { %p527_p9 = pnand %p1006_p8, %p1005_p6 }
 0x1d0   : > { %p528_p3 = pneg %p527_p9 }
 0x1d2   : > { %691 = dma.done.wait (%p528_p3), %s408_s15, 16  }
 0x1d3   : > { %693 = vsyncadd (%p528_p3), %s408_s15, 4294967280  ;;  %s19_s14 = sadd.s32 1, %s716_s14   ;;  %s1007_s9 = smov %s700_s10 }
 0x1d4   : > { %p16_p5 = scmp.ge.s32.totalorder %s19_s14, 4   ;;  %s1008_s10 = smov %s704_s11 }
 0x1d5   : > { %s1009_s11 = smov %s834_s4  ;;  %s1010_s12 = smov %s712_s13 }
 0x1d6   : > { %s1011_s13 = smov %s1013_s22  ;;  %18 = sbr.rel (!%p16_p5) target bundleno = 7 (0x7), region = 86 }
 0x1db   :  { %412 = vsyncpa [#allocation5], 1 }
 0x1dc   :  { %414 = vsyncpa [#allocation5 + $0x1], 1 }
 0x1dd   :  { %415 = vsyncpa [#allocation6], 1 }
 0x1de   :  { %417 = vsyncpa [#allocation6 + $0x1], 1 }
 0x1df   :  { %418 = vsyncpa [#allocation7], 1 }
 0x1e0   :  { %420 = vsyncpa [#allocation7 + $0x1], 1 }

</bundles_post_ra>
